<compile_context>
chip_gen: v6e
topology: v6e:2x2x1
jax: 0.10.0
libtpu: 0.0.40
codegen_flags: <defaults>
</compile_context>

<pallas_src>
import math

import jax
import jax.numpy as jnp
from jax import lax
from jax.experimental import pallas as pl
from jax.experimental.pallas import tpu as pltpu

# ----------------------------------------------------------------------------
# Small, module-consistent hyper-parameters
# ----------------------------------------------------------------------------
NUM_CHANNELS = (1, 32)       # (C_in, C_out)  -- module default is (1, 64)
SIZE_KERNELS = (5,)
ORIENTATIONS = 8             # module default is 16
ZERO_MEAN = True
EFF_KSIZE = SIZE_KERNELS[0]  # single 5x5 kernel -> eff_kernel_size == 5
PAD = EFF_KSIZE // 2


# ----------------------------------------------------------------------------
# Plain-JAX glue mirroring the PyTorch helper functions / sample_kernels
# ----------------------------------------------------------------------------
def rotation_mask(size: int) -> jnp.ndarray:
    g = jnp.linspace(-1.0, 1.0, size)
    gx, gy = jnp.meshgrid(g, g, indexing="ij")
    r = jnp.sqrt(gx ** 2 + gy ** 2)
    return (r <= 1.0 + 1.0 / size).astype(jnp.float32)


def rotation_resampling_grid(orientations: int, size: int) -> jnp.ndarray:
    # == torch.nn.functional.affine_grid(theta, [O,1,size,size], align_corners=False)
    thetas = jnp.linspace(0.0, 2.0 * jnp.pi, orientations + 1)[:orientations]
    cos, sin = jnp.cos(thetas), jnp.sin(thetas)
    coords = (2.0 * jnp.arange(size) + 1.0) / size - 1.0    # align_corners=False
    x = coords[None, :]                                     # varies along W
    y = coords[:, None]                                     # varies along H
    gx = cos[:, None, None] * x - sin[:, None, None] * y    # (O, H, W)
    gy = sin[:, None, None] * x + cos[:, None, None] * y
    return jnp.stack([gx, gy], axis=-1)                     # (O, H, W, 2)


def grid_sample_bilinear_zeros(inp, grid):
    # == F.grid_sample(inp, grid, mode='bilinear', padding_mode='zeros',
    #                  align_corners=False)
    N, C, H, W = inp.shape
    gx, gy = grid[..., 0], grid[..., 1]
    ix = (gx + 1.0) * W * 0.5 - 0.5
    iy = (gy + 1.0) * H * 0.5 - 0.5
    x0 = jnp.floor(ix)
    y0 = jnp.floor(iy)
    inp_t = jnp.transpose(inp, (0, 2, 3, 1))                # (N, H, W, C)
    n_idx = jnp.arange(N)[:, None, None]

    def corner(xi, yi):
        valid = (xi >= 0) & (xi <= W - 1) & (yi >= 0) & (yi <= H - 1)
        xc = jnp.clip(xi, 0, W - 1).astype(jnp.int32)
        yc = jnp.clip(yi, 0, H - 1).astype(jnp.int32)
        v = inp_t[n_idx, yc, xc, :]                         # (N, Ho, Wo, C)
        return v * valid[..., None].astype(inp.dtype)

    wx1 = ix - x0
    wx0 = 1.0 - wx1
    wy1 = iy - y0
    wy0 = 1.0 - wy1
    out = (corner(x0, y0) * (wx0 * wy0)[..., None]
           + corner(x0 + 1.0, y0) * (wx1 * wy0)[..., None]
           + corner(x0, y0 + 1.0) * (wx0 * wy1)[..., None]
           + corner(x0 + 1.0, y0 + 1.0) * (wx1 * wy1)[..., None])
    return jnp.transpose(out, (0, 3, 1, 2))                 # (N, C, Ho, Wo)


def init_weights(key):
    # deterministic kaiming_uniform_(a = sqrt(5)*4/pi) * rotation_mask
    cin, cout = NUM_CHANNELS
    k = SIZE_KERNELS[0]
    fan_in = cin * k * k
    a = math.sqrt(5.0) * 4.0 / math.pi
    gain = math.sqrt(2.0 / (1.0 + a * a))
    bound = gain * math.sqrt(3.0 / fan_in)
    w = jax.random.uniform(key, (cout, cin, k, k), jnp.float32, -bound, bound)
    return w * rotation_mask(k)[None, None]


def sample_kernels(w0):
    # mirrors SE2LiftMultiConv2d.sample_kernels for the single-kernel case
    cout, cin, k, _ = w0.shape
    if ZERO_MEAN:
        w0 = w0 - jnp.mean(w0, axis=(1, 2, 3), keepdims=True)
    mask = rotation_mask(EFF_KSIZE)
    w = w0 * mask[None, None]                               # fuse (1 kernel) * mask
    w2d = jnp.broadcast_to(w.reshape(1, cout * cin, k, k),
                           (ORIENTATIONS, cout * cin, k, k))
    grid = rotation_resampling_grid(ORIENTATIONS, EFF_KSIZE)
    w_rot = grid_sample_bilinear_zeros(w2d, grid)           # (O, cout*cin, k, k)
    w_rot = w_rot.reshape(ORIENTATIONS, cout, cin, k, k) * mask
    return w_rot                                            # (O, cout, cin, k, k)


# ----------------------------------------------------------------------------
# Pallas kernel: one MXU matmul per grid step
#   w_ref : (tile_o, KKP)      rotated-kernel tile, row o = orient*C_out + c
#   p_ref : (1, KKP, tile_hw)  im2col patches (tap, pixel) for one batch strip
#   o_ref : (1, tile_o, tile_hw)
# ----------------------------------------------------------------------------
def _lift_conv_matmul_kernel(w_ref, p_ref, o_ref):
    o_ref[0] = jnp.dot(w_ref[...], p_ref[0],
                       preferred_element_type=jnp.float32)


def se2_lift_conv2d(x, w_sampled, L=1.0, *, tile_o=None, tile_hw=None):
    """x: (B, 1, H, W) NCHW float32.  Returns (B, orientations, C_out, H, W)."""
    B, cin, H, W = x.shape
    assert cin == 1
    ori, cout, _, K, _ = w_sampled.shape
    O = ori * cout
    HW = H * W
    KK = K * K
    KKP = ((KK + 7) // 8) * 8          # pad taps to a sublane multiple (25 -> 32)

    if tile_o is None:
        tile_o = min(O, 256)           # full 256-wide MXU on v6e/v7x; use 128 on v5e
    assert O % tile_o == 0 and tile_o % 8 == 0

    if tile_hw is None:
        # Strip-mine the spatial (lane) axis so the f32 output block stays a few
        # MiB even at production image sizes (v7x has only 64 MiB VMEM).
        cap = 4096
        tile_hw = HW
        if HW > cap:
            for cand in range(cap, 0, -128):
                if HW % cand == 0:
                    tile_hw = cand
                    break
    assert HW % tile_hw == 0

    # Fold the 1/sqrt(L) spectral-norm scale into the tiny weight matrix instead
    # of rescaling x (avoids a full extra HBM pass over the input).
    inv_sqrt_l = lax.rsqrt(jnp.asarray(L, jnp.float32))
    wmat = w_sampled.reshape(O, KK) * inv_sqrt_l            # (O, 25)
    wmat = jnp.pad(wmat, ((0, 0), (0, KKP - KK)))           # (O, 32)

    # im2col in the wrapper (review-sanctioned): patches[b, t, h*W + w] =
    # x_pad[b, h+dh, w+dw] with t = dh*K + dw; extra rows are zero padding.
    xp = jnp.pad(x[:, 0], ((0, 0), (PAD, PAD), (PAD, PAD)))          # (B, Hp, Wp)
    cols = [xp[:, dh:dh + H, dw:dw + W] for dh in range(K) for dw in range(K)]
    cols += [jnp.zeros_like(cols[0])] * (KKP - KK)
    patches = jnp.stack(cols, axis=1).reshape(B, KKP, HW)            # (B, 32, HW)

    # Grid: (batch, spatial strip, output-channel tile) with the O axis innermost
    # so the patch tile index (b, 0, m) is constant across it -> no re-DMA of
    # patches while sweeping output-channel tiles.
    grid = (B, HW // tile_hw, O // tile_o)
    y = pl.pallas_call(
        _lift_conv_matmul_kernel,
        out_shape=jax.ShapeDtypeStruct((B, O, HW), jnp.float32),
        grid_spec=pltpu.PrefetchScalarGridSpec(
            num_scalar_prefetch=0,
            grid=grid,
            in_specs=[
                pl.BlockSpec((tile_o, KKP), lambda b, m, j: (j, 0)),
                pl.BlockSpec((1, KKP, tile_hw), lambda b, m, j: (b, 0, m)),
            ],
            out_specs=pl.BlockSpec((1, tile_o, tile_hw),
                                   lambda b, m, j: (b, j, m)),
        ),
        compiler_params=pltpu.CompilerParams(
            dimension_semantics=("parallel", "parallel", "parallel")),
    )(wmat, patches)

    # (B, O, H*W) -> (B, orientations, C_out, H, W): pure reshape, no transpose,
    # no second HBM pass over the output.
    return y.reshape(B, ori, cout, H, W)


# ----------------------------------------------------------------------------
# Pure-JAX reference (for verification only)
# ----------------------------------------------------------------------------
def reference_forward(x, w_sampled):
    ori, cout, cin, K, _ = w_sampled.shape
    w_flat = w_sampled.reshape(ori * cout, cin, K, K)
    y = lax.conv_general_dilated(
        x, w_flat, window_strides=(1, 1), padding=[(PAD, PAD), (PAD, PAD)],
        dimension_numbers=("NCHW", "OIHW", "NCHW"),
        precision=lax.Precision.HIGHEST)
    B = x.shape[0]
    return y.reshape(B, ori, cout, y.shape[-2], y.shape[-1])


if __name__ == "__main__":
    key = jax.random.PRNGKey(0)
    kw, kx = jax.random.split(key)

    w0 = init_weights(kw)                               # (C_out, C_in, 5, 5)
    x = jax.random.normal(kx, (2, 1, 16, 16), jnp.float32)

    w_sampled = sample_kernels(w0)                      # (orient, C_out, C_in, 5, 5)
    y = se2_lift_conv2d(x, w_sampled, L=1.0)
    y = jax.block_until_ready(y)

    assert y.shape == (2, ORIENTATIONS, NUM_CHANNELS[1], 16, 16)
    # Tolerance is sized for the MXU's internal bf16-pass handling of f32
    # matmuls vs. the HIGHEST-precision XLA conv reference (see perf-review
    # correctness note); observed error is typically far below this bound.
    y_ref = reference_forward(x, w_sampled)
    max_err = jnp.max(jnp.abs(y - y_ref))
    assert jnp.allclose(y, y_ref, atol=1e-2, rtol=1e-2), f"max abs err = {max_err}"
    print("KERNEL_OK")
</pallas_src>

<mosaic_0001>
module attributes {stable_mosaic.version = 11 : i64} {
  func.func @_lift_conv_matmul_kernel(%arg0: i32, %arg1: i32, %arg2: i32, %arg3: memref<256x32xf32, #tpu.memory_space<vmem>>, %arg4: memref<1x32x256xf32, #tpu.memory_space<vmem>>, %arg5: memref<1x256x256xf32, #tpu.memory_space<vmem>>) attributes {dimension_semantics = [#tpu.dimension_semantics<parallel>, #tpu.dimension_semantics<parallel>, #tpu.dimension_semantics<parallel>], iteration_bounds = array<i64: 2, 1, 1>, scalar_prefetch = 0 : i64, scratch_operands = 0 : i64, tpu.core_type = #tpu.core_type<tc>, window_params = [{transform_indices = @transform_0, window_bounds = array<i64: 256, 32>}, {transform_indices = @transform_1, window_bounds = array<i64: 1, 32, 256>}, {transform_indices = @transform_2, window_bounds = array<i64: 1, 256, 256>}]} {
    %c0 = arith.constant 0 : index
    %c0_0 = arith.constant 0 : index
    %0 = vector.load %arg3[%c0, %c0_0] : memref<256x32xf32, #tpu.memory_space<vmem>>, vector<256x32xf32>
    %c0_1 = arith.constant 0 : index
    %c0_2 = arith.constant 0 : index
    %c0_3 = arith.constant 0 : index
    %1 = vector.load %arg4[%c0_1, %c0_2, %c0_3] : memref<1x32x256xf32, #tpu.memory_space<vmem>>, vector<1x32x256xf32>
    %2 = vector.shape_cast %1 : vector<1x32x256xf32> to vector<32x256xf32>
    %cst = arith.constant dense<0.000000e+00> : vector<256x256xf32>
    %3 = tpu.matmul %0, %2, %cst {dimension_numbers = #tpu.dot_dimension_numbers<[1], [0], [0], [1], [0, 0, 1, 1], [], []>} : vector<256x32xf32>, vector<32x256xf32>, vector<256x256xf32> -> vector<256x256xf32>
    %c0_4 = arith.constant 0 : index
    %c0_5 = arith.constant 0 : index
    %c0_6 = arith.constant 0 : index
    %4 = vector.load %arg5[%c0_4, %c0_5, %c0_6] : memref<1x256x256xf32, #tpu.memory_space<vmem>>, vector<1x256x256xf32>
    %5 = vector.shape_cast %4 : vector<1x256x256xf32> to vector<256x256xf32>
    %6 = vector.shape_cast %3 : vector<256x256xf32> to vector<1x256x256xf32>
    tpu.vector_store %arg5[%c0_4, %c0_5, %c0_6], %6 {strides = array<i32>} : memref<1x256x256xf32, #tpu.memory_space<vmem>>, vector<1x256x256xf32>,
    return
  }
  func.func @transform_0(%arg0: i32, %arg1: i32, %arg2: i32) -> (i32, i32) {
    %c0_i32 = arith.constant 0 : i32
    %c0_i32_0 = arith.constant 0 : i32
    return %arg2, %c0_i32 : i32, i32
  }
  func.func @transform_1(%arg0: i32, %arg1: i32, %arg2: i32) -> (i32, i32, i32) {
    %c0_i32 = arith.constant 0 : i32
    %c0_i32_0 = arith.constant 0 : i32
    return %arg0, %c0_i32, %arg1 : i32, i32, i32
  }
  func.func @transform_2(%arg0: i32, %arg1: i32, %arg2: i32) -> (i32, i32, i32) {
    %c0_i32 = arith.constant 0 : i32
    return %arg0, %arg2, %arg1 : i32, i32, i32
  }
}

</mosaic_0001>

<bundles_post_ra>
// kernel: tpu_custom_call.1
= control target key start
LH: loop header
LB: loop body
LE: loop exit
PB: predicated region body
PF: predicated region fallthrough
CT: control target
= control target key end

     0   :  { %7 = vsyncpa [#allocation3], 0  ;;  %s1337_s0 = inlined_call_operand.vmem [shape: f32[256,32], index: 0, kind: input, shape index: {}]   ;;  %s1338_s1 = inlined_call_operand.vmem [shape: f32[2,32,256], index: 1, kind: input, shape index: {}]   ;;  %s1339_s2 = inlined_call_operand.hbm [shape: f32[2,256,256], index: 2, kind: output, shape index: {}]  }
   0x1   :  { %9 = vsyncpa [#allocation3 + $0x1], 0  ;;  %s992_s9 = smov 0   ;;  %s994_s10 = smov 0  }
   0x2   :  { %s996_s11 = smov 0   ;;  %s998_s12 = smov 0  }
   0x3   :  { %s1000_s13 = smov 0   ;;  %s1002_s14 = smov 0  }
   0x4 LB: > { %s781_s15 = sadd.s32 4294967295, %s971_s14   ;;  %s782_s16 = sadd.s32 4294967294, %s971_s14   ;;  %s971_s14 = sphi %s1002_s14, %s15_s14   ;;  %s967_s13 = sphi %s1000_s13, %s1346_s13   ;;  %s963_s12 = sphi %s998_s12, %s1345_s12   ;;  %s959_s11 = sphi %s996_s11, %s1344_s11   ;;  %s955_s10 = sphi %s994_s10, %s1343_s10   ;;  %s951_s9 = sphi %s992_s9, %s1342_s9  }
   0x5   : > { %s34_s17 = sadd.s32 1, %s967_s13  ;;  %s99_s18 = sadd.s32 1, %s959_s11 }
   0x6   : > { %p36_p0 = scmp.ge.s32.totalorder %s34_s17, 2  ;;  %p109_p1 = scmp.ne.s32.totalorder %s959_s11, %s955_s10 }
   0x7   : > { %p110_p2 = scmp.eq.s32.totalorder %s781_s15, 1  ;;  %p115_p3 = scmp.ne.s32.totalorder %s955_s10, %s951_s9 }
   0x8   : > { %s1348_s17 = smov (%p36_p0, %s34_s17), 0  ;;  %p116_p5 = scmp.eq.s32.totalorder %s782_s16, 1 }
   0x9   : > { %p1032_p4 = por %p110_p2, %p109_p1  ;;  %s92_s20 = ssub.s32 %s967_s13, %s1348_s17 }
   0xa   : > { %p786_p6 = scmp.ge.s32.totalorder %s971_s14, 1  ;;  %p97_p7 = scmp.eq.s32.totalorder %s92_s20, 0 }
   0xb   : > { %p1039_p8 = por %p116_p5, %p115_p3  ;;  %p156_p9 = scmp.lt.s32.totalorder %s971_s14, 3 }
   0xc   : > { %s1045_s22 = scalar_select %p97_p7, %s959_s11, %s99_s18  }
   0xd   : > { %p157_p10 = pnand %p786_p6, %p156_p9 }
   0xe   : > { %p194_p11 = scmp.lt.s32.totalorder (!%p157_p10), %s963_s12, 1  ;;  %s184_s16 = sand.u32 (!%p157_p10), 1, %s955_s10  }
   0xf   : > { %160 = sbr.rel (%p157_p10) target bundleno = 302 (0x12e), region = 28  ;;  %s787_s18 = sshll.u32 (!%p157_p10), %s184_s16, 9 }
  0x10   : > { %s1215_s20 = scalar_lea.vmem (!%p157_p10), [#allocation2], %s787_s18  ;;  %s974_s29 = smov (!%p157_p10), [#allocation2]  }
  0x11   : > { %s899_s30 = sshll.u32 (!%p157_p10), %s974_s29, 4  ;;  %s900_s30 = int_to_ptr.vmem [resolvable:$false] %s899_s30 }
  0x12   : > { %s901_s3 = scalar_lea.vmem (!%p157_p10), %s900_s30, 16384 }
  0x14   : > { %v973_v0 = vmov 0.0   ;;  %s195_s23 = scalar_select %p194_p11, %s963_s12, 1  ;;  %v205_v9 = vld [vmem:[%s1337_s0] sm:$0xff]  ;;  %vm245_vm0 = vcmask 261120   ;;  %v206_v11 = vld [vmem:[%s1337_s0 + $0x8] sm:$0xff]  ;;  %v207_v13 = vld [vmem:[%s1337_s0 + $0x10] sm:$0xff] }
  0x15   : > { %406 = vmatprep.mubr.f32.mxu0 %v973_v0  ;;  %502 = vmatprep.mubr.f32.mxu1 %v973_v0  ;;  %v221_v10 = vld [vmem:[%s1337_s0 + $0x80] sm:$0xff]  ;;  %v222_v12 = vld [vmem:[%s1337_s0 + $0x88] sm:$0xff]  ;;  %v223_v14 = vld [vmem:[%s1337_s0 + $0x90] sm:$0xff] }
  0x16   : > { %s827_s24 = sshll.u32 %s195_s23, 6  ;;  %v208_v15 = vld [vmem:[%s1337_s0 + $0x18] sm:$0xff]  ;;  %v209_v17 = vld [vmem:[%s1337_s0 + $0x20] sm:$0xff]  ;;  %v210_v19 = vld [vmem:[%s1337_s0 + $0x28] sm:$0xff]  ;;  %s828_s23 = sshll.u32 %s963_s12, 13 }
  0x17   : > { %s201_s27 = scalar_lea.vmem %s1338_s1, %s827_s24  ;;  %v224_v16 = vld [vmem:[%s1337_s0 + $0x98] sm:$0xff]  ;;  %v225_v18 = vld [vmem:[%s1337_s0 + $0xa0] sm:$0xff]  ;;  %v226_v20 = vld [vmem:[%s1337_s0 + $0xa8] sm:$0xff]  ;;  %s682_s24 = sshll.u32 %s1215_s20, 4  ;;  %s1284_s24 = int_to_ptr.vmem [resolvable:$true] %s682_s24 }
  0x18   : > { %v244_v1 = vld [vmem:[%s201_s27 + $0x38] sm:$0xff]  ;;  %v243_v2 = vld [vmem:[%s201_s27 + $0x30] sm:$0xff]  ;;  %v242_v3 = vld [vmem:[%s201_s27 + $0x28] sm:$0xff]  ;;  %s1292_s12 = scalar_lea.sflag [#allocation3], %s184_s16  ;;  %s895_s28 = scalar_lea.vmem %s1284_s24, 8192 }
  0x19   : > { %366 = vmatprep.subr.mxu0 %v244_v1  ;;  %829 = vmatprep.subr.mxu1 %v244_v1  ;;  %v241_v4 = vld [vmem:[%s201_s27 + $0x20] sm:$0xff]  ;;  %v240_v5 = vld [vmem:[%s201_s27 + $0x18] sm:$0xff]  ;;  %v239_v6 = vld [vmem:[%s201_s27 + $0x10] sm:$0xff]  ;;  %p896_p12 = scmp.ne.s32.totalorder %s1284_s24, %s895_s28  ;;  %p902_p1 = scmp.lt.s32.totalorder %s1284_s24, %s900_s30 }
  0x1a   : > { %367 = vmatpush1.msra.mxu0 %v243_v2  ;;  %833 = vmatpush1.msra.mxu1 %v243_v2  ;;  %v238_v7 = vld [vmem:[%s201_s27 + $0x8] sm:$0xff]  ;;  %v237_v8 = vld [vmem:[%s201_s27] sm:$0xff]  ;;  %v211_v21 = vld [vmem:[%s1337_s0 + $0x30] sm:$0xff]  ;;  %s1282_s27 = scalar_lea.hbm %s1339_s2, %s828_s23  ;;  %p903_p2 = scmp.lt.s32.totalorder %s901_s3, %s895_s28 }
  0x1b   : > { %368 = vmatprep.subr.mxu0 %v242_v3  ;;  %830 = vmatprep.subr.mxu1 %v242_v3  ;;  %v227_v22 = vld [vmem:[%s1337_s0 + $0xb0] sm:$0xff]  ;;  %v212_v23 = vld [vmem:[%s1337_s0 + $0x38] sm:$0xff]  ;;  %v213_v25 = vld [vmem:[%s1337_s0 + $0x40] sm:$0xff]  ;;  %p897_p13 = pnand %p896_p12, %p1032_p4 }
  0x1c   : > { %369 = vmatpush1.msra.mxu0 %v241_v4  ;;  %834 = vmatpush1.msra.mxu1 %v241_v4  ;;  %v228_v24 = vld [vmem:[%s1337_s0 + $0xb8] sm:$0xff]  ;;  %v229_v26 = vld [vmem:[%s1337_s0 + $0xc0] sm:$0xff]  ;;  %v214_v27 = vld [vmem:[%s1337_s0 + $0x48] sm:$0xff]  ;;  %p904_p3 = por %p903_p2, %p902_p1 }
  0x1d   : > { %370 = vmatprep.subr.mxu0 %v240_v5  ;;  %831 = vmatprep.subr.mxu1 %v240_v5  ;;  %v230_v28 = vld [vmem:[%s1337_s0 + $0xc8] sm:$0xff]  ;;  %v215_v29 = vld [vmem:[%s1337_s0 + $0x50] sm:$0xff]  ;;  %v216_v31 = vld [vmem:[%s1337_s0 + $0x58] sm:$0xff]  ;;  %p898_p0 = pneg %p897_p13 }
  0x1e   : > { %371 = vmatpush1.msra.mxu0 %v239_v6  ;;  %835 = vmatpush1.msra.mxu1 %v239_v6  ;;  %v231_v30 = vld [vmem:[%s1337_s0 + $0xd0] sm:$0xff]  ;;  %v232_v32 = vld [vmem:[%s1337_s0 + $0xd8] sm:$0xff]  ;;  %v217_v33 = vld [vmem:[%s1337_s0 + $0x60] sm:$0xff] }
  0x1f   : > { %372 = vmatprep.subr.mxu0 %v238_v7  ;;  %832 = vmatprep.subr.mxu1 %v238_v7  ;;  %v233_v34 = vld [vmem:[%s1337_s0 + $0xe0] sm:$0xff]  ;;  %v218_v35 = vld [vmem:[%s1337_s0 + $0x68] sm:$0xff]  ;;  %v219_v37 = vld [vmem:[%s1337_s0 + $0x70] sm:$0xff]  ;;  %p905_p5 = pnand %p904_p3, %p898_p0 }
  0x20   : > { %373 = vmatpush1.msra.mxu0 %v237_v8  ;;  %836 = vmatpush1.msra.mxu1 %v237_v8  ;;  %v234_v36 = vld [vmem:[%s1337_s0 + $0xe8] sm:$0xff]  ;;  %v235_v38 = vld [vmem:[%s1337_s0 + $0xf0] sm:$0xff]  ;;  %v220_v39 = vld [vmem:[%s1337_s0 + $0x78] sm:$0xff] }
  0x21   : > { %790 = vmatmul.mubr.msk.f32.vlgmr.msra.gmra.mxu0 %vm245_vm0, %v205_v9  ;;  %806 = vmatmul.mubr.msk.f32.vlgmr.msra.gmra.mxu1 %vm245_vm0, %v221_v10  ;;  %v236_v40 = vld [vmem:[%s1337_s0 + $0xf8] sm:$0xff] }
  0x22   : > { %412 = vmatprep.mubr.f32.mxu0 %v973_v0  ;;  %508 = vmatprep.mubr.f32.mxu1 %v973_v0 }
  0x25   : > { %791 = vmatmul.mubr.msk.f32.gmra.mxu0 %vm245_vm0, %v206_v11  ;;  %807 = vmatmul.mubr.msk.f32.gmra.mxu1 %vm245_vm0, %v222_v12 }
  0x26   : > { %418 = vmatprep.mubr.f32.mxu0 %v973_v0  ;;  %514 = vmatprep.mubr.f32.mxu1 %v973_v0 }
  0x29   : > { %792 = vmatmul.mubr.msk.f32.gmra.mxu0 %vm245_vm0, %v207_v13  ;;  %808 = vmatmul.mubr.msk.f32.gmra.mxu1 %vm245_vm0, %v223_v14 }
  0x2a   : > { %424 = vmatprep.mubr.f32.mxu0 %v973_v0  ;;  %520 = vmatprep.mubr.f32.mxu1 %v973_v0 }
  0x2d   : > { %793 = vmatmul.mubr.msk.f32.gmra.mxu0 %vm245_vm0, %v208_v15  ;;  %809 = vmatmul.mubr.msk.f32.gmra.mxu1 %vm245_vm0, %v224_v16 }
  0x2e   : > { %430 = vmatprep.mubr.f32.mxu0 %v973_v0  ;;  %526 = vmatprep.mubr.f32.mxu1 %v973_v0 }
  0x31   : > { %794 = vmatmul.mubr.msk.f32.gmra.mxu0 %vm245_vm0, %v209_v17  ;;  %810 = vmatmul.mubr.msk.f32.gmra.mxu1 %vm245_vm0, %v225_v18 }
  0x32   : > { %436 = vmatprep.mubr.f32.mxu0 %v973_v0  ;;  %532 = vmatprep.mubr.f32.mxu1 %v973_v0 }
  0x35   : > { %795 = vmatmul.mubr.msk.f32.gmra.mxu0 %vm245_vm0, %v210_v19  ;;  %811 = vmatmul.mubr.msk.f32.gmra.mxu1 %vm245_vm0, %v226_v20 }
  0x36   : > { %442 = vmatprep.mubr.f32.mxu0 %v973_v0  ;;  %538 = vmatprep.mubr.f32.mxu1 %v973_v0 }
  0x39   : > { %796 = vmatmul.mubr.msk.f32.gmra.mxu0 %vm245_vm0, %v211_v21  ;;  %812 = vmatmul.mubr.msk.f32.gmra.mxu1 %vm245_vm0, %v227_v22 }
  0x3a   : > { %448 = vmatprep.mubr.f32.mxu0 %v973_v0  ;;  %544 = vmatprep.mubr.f32.mxu1 %v973_v0 }
  0x3d   : > { %797 = vmatmul.mubr.msk.f32.gmra.mxu0 %vm245_vm0, %v212_v23  ;;  %813 = vmatmul.mubr.msk.f32.gmra.mxu1 %vm245_vm0, %v228_v24 }
  0x3e   : > { %454 = vmatprep.mubr.f32.mxu0 %v973_v0  ;;  %550 = vmatprep.mubr.f32.mxu1 %v973_v0 }
  0x41   : > { %798 = vmatmul.mubr.msk.f32.gmra.mxu0 %vm245_vm0, %v213_v25  ;;  %814 = vmatmul.mubr.msk.f32.gmra.mxu1 %vm245_vm0, %v229_v26 }
  0x42   : > { %460 = vmatprep.mubr.f32.mxu0 %v973_v0  ;;  %556 = vmatprep.mubr.f32.mxu1 %v973_v0 }
  0x45   : > { %799 = vmatmul.mubr.msk.f32.gmra.mxu0 %vm245_vm0, %v214_v27  ;;  %815 = vmatmul.mubr.msk.f32.gmra.mxu1 %vm245_vm0, %v230_v28 }
  0x46   : > { %466 = vmatprep.mubr.f32.mxu0 %v973_v0  ;;  %562 = vmatprep.mubr.f32.mxu1 %v973_v0 }
  0x49   : > { %800 = vmatmul.mubr.msk.f32.gmra.mxu0 %vm245_vm0, %v215_v29  ;;  %816 = vmatmul.mubr.msk.f32.gmra.mxu1 %vm245_vm0, %v231_v30 }
  0x4a   : > { %472 = vmatprep.mubr.f32.mxu0 %v973_v0  ;;  %568 = vmatprep.mubr.f32.mxu1 %v973_v0 }
  0x4d   : > { %801 = vmatmul.mubr.msk.f32.gmra.mxu0 %vm245_vm0, %v216_v31  ;;  %817 = vmatmul.mubr.msk.f32.gmra.mxu1 %vm245_vm0, %v232_v32 }
  0x4e   : > { %478 = vmatprep.mubr.f32.mxu0 %v973_v0  ;;  %574 = vmatprep.mubr.f32.mxu1 %v973_v0 }
  0x51   : > { %802 = vmatmul.mubr.msk.f32.gmra.mxu0 %vm245_vm0, %v217_v33  ;;  %818 = vmatmul.mubr.msk.f32.gmra.mxu1 %vm245_vm0, %v233_v34 }
  0x52   : > { %484 = vmatprep.mubr.f32.mxu0 %v973_v0  ;;  %580 = vmatprep.mubr.f32.mxu1 %v973_v0 }
  0x55   : > { %803 = vmatmul.mubr.msk.f32.gmra.mxu0 %vm245_vm0, %v218_v35  ;;  %819 = vmatmul.mubr.msk.f32.gmra.mxu1 %vm245_vm0, %v234_v36 }
  0x56   : > { %490 = vmatprep.mubr.f32.mxu0 %v973_v0  ;;  %586 = vmatprep.mubr.f32.mxu1 %v973_v0 }
  0x59   : > { %804 = vmatmul.mubr.msk.f32.gmra.mxu0 %vm245_vm0, %v219_v37  ;;  %820 = vmatmul.mubr.msk.f32.gmra.mxu1 %vm245_vm0, %v235_v38 }
  0x5a   : > { %496 = vmatprep.mubr.f32.mxu0 %v973_v0  ;;  %592 = vmatprep.mubr.f32.mxu1 %v973_v0 }
  0x5d   : > { %805 = vmatmul.mubr.msk.f32.gmra.mxu0 %vm245_vm0, %v220_v39  ;;  %821 = vmatmul.mubr.msk.f32.gmra.mxu1 %vm245_vm0, %v236_v40 }
  0xe1   : > { %v408_v41 = vpop.f32.mrf.mxu0  ;;  %v504_v42 = vpop.f32.mrf.mxu1 }
  0xe2   : > { %599 = vst [vmem:[%s1215_s20] sm:$0xff] %v408_v41  ;;  %631 = vst [vmem:[%s1215_s20 + $0x100] sm:$0xff] %v504_v42 }
  0xe3   : > { %v410_v43 = vpop.f32.mrf.mxu0  ;;  %v506_v44 = vpop.f32.mrf.mxu1 }
  0xe4   : > { %600 = vst [vmem:[%s1215_s20 + $0x8] sm:$0xff] %v410_v43  ;;  %632 = vst [vmem:[%s1215_s20 + $0x108] sm:$0xff] %v506_v44 }
  0xe5   : > { %v414_v45 = vpop.f32.mrf.mxu0  ;;  %v510_v46 = vpop.f32.mrf.mxu1 }
  0xe6   : > { %601 = vst [vmem:[%s1215_s20 + $0x10] sm:$0xff] %v414_v45  ;;  %633 = vst [vmem:[%s1215_s20 + $0x110] sm:$0xff] %v510_v46 }
  0xe7   : > { %v416_v47 = vpop.f32.mrf.mxu0  ;;  %v512_v48 = vpop.f32.mrf.mxu1 }
  0xe8   : > { %602 = vst [vmem:[%s1215_s20 + $0x18] sm:$0xff] %v416_v47  ;;  %634 = vst [vmem:[%s1215_s20 + $0x118] sm:$0xff] %v512_v48 }
  0xe9   : > { %v420_v49 = vpop.f32.mrf.mxu0  ;;  %v516_v50 = vpop.f32.mrf.mxu1 }
  0xea   : > { %603 = vst [vmem:[%s1215_s20 + $0x20] sm:$0xff] %v420_v49  ;;  %635 = vst [vmem:[%s1215_s20 + $0x120] sm:$0xff] %v516_v50 }
  0xeb   : > { %v422_v51 = vpop.f32.mrf.mxu0  ;;  %v518_v52 = vpop.f32.mrf.mxu1 }
  0xec   : > { %604 = vst [vmem:[%s1215_s20 + $0x28] sm:$0xff] %v422_v51  ;;  %636 = vst [vmem:[%s1215_s20 + $0x128] sm:$0xff] %v518_v52 }
  0xed   : > { %v426_v53 = vpop.f32.mrf.mxu0  ;;  %v522_v54 = vpop.f32.mrf.mxu1 }
  0xee   : > { %605 = vst [vmem:[%s1215_s20 + $0x30] sm:$0xff] %v426_v53  ;;  %637 = vst [vmem:[%s1215_s20 + $0x130] sm:$0xff] %v522_v54 }
  0xef   : > { %v428_v55 = vpop.f32.mrf.mxu0  ;;  %v524_v56 = vpop.f32.mrf.mxu1 }
  0xf0   : > { %606 = vst [vmem:[%s1215_s20 + $0x38] sm:$0xff] %v428_v55  ;;  %638 = vst [vmem:[%s1215_s20 + $0x138] sm:$0xff] %v524_v56 }
  0xf1   : > { %v432_v57 = vpop.f32.mrf.mxu0  ;;  %v528_v58 = vpop.f32.mrf.mxu1 }
  0xf2   : > { %607 = vst [vmem:[%s1215_s20 + $0x40] sm:$0xff] %v432_v57  ;;  %639 = vst [vmem:[%s1215_s20 + $0x140] sm:$0xff] %v528_v58 }
  0xf3   : > { %v434_v59 = vpop.f32.mrf.mxu0  ;;  %v530_v60 = vpop.f32.mrf.mxu1 }
  0xf4   : > { %608 = vst [vmem:[%s1215_s20 + $0x48] sm:$0xff] %v434_v59  ;;  %640 = vst [vmem:[%s1215_s20 + $0x148] sm:$0xff] %v530_v60 }
  0xf5   : > { %v438_v61 = vpop.f32.mrf.mxu0  ;;  %v534_v62 = vpop.f32.mrf.mxu1 }
  0xf6   : > { %609 = vst [vmem:[%s1215_s20 + $0x50] sm:$0xff] %v438_v61  ;;  %641 = vst [vmem:[%s1215_s20 + $0x150] sm:$0xff] %v534_v62 }
  0xf7   : > { %v440_v63 = vpop.f32.mrf.mxu0  ;;  %v536_v0 = vpop.f32.mrf.mxu1 }
  0xf8   : > { %610 = vst [vmem:[%s1215_s20 + $0x58] sm:$0xff] %v440_v63  ;;  %642 = vst [vmem:[%s1215_s20 + $0x158] sm:$0xff] %v536_v0 }
  0xf9   : > { %v444_v1 = vpop.f32.mrf.mxu0  ;;  %v540_v2 = vpop.f32.mrf.mxu1 }
  0xfa   : > { %611 = vst [vmem:[%s1215_s20 + $0x60] sm:$0xff] %v444_v1  ;;  %643 = vst [vmem:[%s1215_s20 + $0x160] sm:$0xff] %v540_v2 }
  0xfb   : > { %v446_v3 = vpop.f32.mrf.mxu0  ;;  %v542_v4 = vpop.f32.mrf.mxu1 }
  0xfc   : > { %612 = vst [vmem:[%s1215_s20 + $0x68] sm:$0xff] %v446_v3  ;;  %644 = vst [vmem:[%s1215_s20 + $0x168] sm:$0xff] %v542_v4 }
  0xfd   : > { %v450_v5 = vpop.f32.mrf.mxu0  ;;  %v546_v6 = vpop.f32.mrf.mxu1 }
  0xfe   : > { %613 = vst [vmem:[%s1215_s20 + $0x70] sm:$0xff] %v450_v5  ;;  %645 = vst [vmem:[%s1215_s20 + $0x170] sm:$0xff] %v546_v6 }
  0xff   : > { %v452_v7 = vpop.f32.mrf.mxu0  ;;  %v548_v8 = vpop.f32.mrf.mxu1 }
 0x100   : > { %614 = vst [vmem:[%s1215_s20 + $0x78] sm:$0xff] %v452_v7  ;;  %646 = vst [vmem:[%s1215_s20 + $0x178] sm:$0xff] %v548_v8 }
 0x101   : > { %v456_v9 = vpop.f32.mrf.mxu0  ;;  %v552_v10 = vpop.f32.mrf.mxu1 }
 0x102   : > { %615 = vst [vmem:[%s1215_s20 + $0x80] sm:$0xff] %v456_v9  ;;  %647 = vst [vmem:[%s1215_s20 + $0x180] sm:$0xff] %v552_v10 }
 0x103   : > { %v458_v11 = vpop.f32.mrf.mxu0  ;;  %v554_v12 = vpop.f32.mrf.mxu1 }
 0x104   : > { %616 = vst [vmem:[%s1215_s20 + $0x88] sm:$0xff] %v458_v11  ;;  %648 = vst [vmem:[%s1215_s20 + $0x188] sm:$0xff] %v554_v12 }
 0x105   : > { %v462_v13 = vpop.f32.mrf.mxu0  ;;  %v558_v14 = vpop.f32.mrf.mxu1 }
 0x106   : > { %617 = vst [vmem:[%s1215_s20 + $0x90] sm:$0xff] %v462_v13  ;;  %649 = vst [vmem:[%s1215_s20 + $0x190] sm:$0xff] %v558_v14 }
 0x107   : > { %v464_v15 = vpop.f32.mrf.mxu0  ;;  %v560_v16 = vpop.f32.mrf.mxu1 }
 0x108   : > { %618 = vst [vmem:[%s1215_s20 + $0x98] sm:$0xff] %v464_v15  ;;  %650 = vst [vmem:[%s1215_s20 + $0x198] sm:$0xff] %v560_v16 }
 0x109   : > { %v468_v17 = vpop.f32.mrf.mxu0  ;;  %v564_v18 = vpop.f32.mrf.mxu1 }
 0x10a   : > { %619 = vst [vmem:[%s1215_s20 + $0xa0] sm:$0xff] %v468_v17  ;;  %651 = vst [vmem:[%s1215_s20 + $0x1a0] sm:$0xff] %v564_v18 }
 0x10b   : > { %v470_v19 = vpop.f32.mrf.mxu0  ;;  %v566_v20 = vpop.f32.mrf.mxu1 }
 0x10c   : > { %620 = vst [vmem:[%s1215_s20 + $0xa8] sm:$0xff] %v470_v19  ;;  %652 = vst [vmem:[%s1215_s20 + $0x1a8] sm:$0xff] %v566_v20 }
 0x10d   : > { %v474_v21 = vpop.f32.mrf.mxu0  ;;  %v570_v22 = vpop.f32.mrf.mxu1 }
 0x10e   : > { %621 = vst [vmem:[%s1215_s20 + $0xb0] sm:$0xff] %v474_v21  ;;  %653 = vst [vmem:[%s1215_s20 + $0x1b0] sm:$0xff] %v570_v22 }
 0x10f   : > { %v476_v23 = vpop.f32.mrf.mxu0  ;;  %v572_v24 = vpop.f32.mrf.mxu1 }
 0x110   : > { %622 = vst [vmem:[%s1215_s20 + $0xb8] sm:$0xff] %v476_v23  ;;  %654 = vst [vmem:[%s1215_s20 + $0x1b8] sm:$0xff] %v572_v24 }
 0x111   : > { %v480_v25 = vpop.f32.mrf.mxu0  ;;  %v576_v26 = vpop.f32.mrf.mxu1 }
 0x112   : > { %623 = vst [vmem:[%s1215_s20 + $0xc0] sm:$0xff] %v480_v25  ;;  %655 = vst [vmem:[%s1215_s20 + $0x1c0] sm:$0xff] %v576_v26 }
 0x113   : > { %v482_v27 = vpop.f32.mrf.mxu0  ;;  %v578_v28 = vpop.f32.mrf.mxu1 }
 0x114   : > { %624 = vst [vmem:[%s1215_s20 + $0xc8] sm:$0xff] %v482_v27  ;;  %656 = vst [vmem:[%s1215_s20 + $0x1c8] sm:$0xff] %v578_v28 }
 0x115   : > { %v486_v29 = vpop.f32.mrf.mxu0  ;;  %v582_v30 = vpop.f32.mrf.mxu1 }
 0x116   : > { %625 = vst [vmem:[%s1215_s20 + $0xd0] sm:$0xff] %v486_v29  ;;  %657 = vst [vmem:[%s1215_s20 + $0x1d0] sm:$0xff] %v582_v30 }
 0x117   : > { %v488_v31 = vpop.f32.mrf.mxu0  ;;  %v584_v32 = vpop.f32.mrf.mxu1 }
 0x118   : > { %626 = vst [vmem:[%s1215_s20 + $0xd8] sm:$0xff] %v488_v31  ;;  %658 = vst [vmem:[%s1215_s20 + $0x1d8] sm:$0xff] %v584_v32 }
 0x119   : > { %v492_v33 = vpop.f32.mrf.mxu0  ;;  %v588_v34 = vpop.f32.mrf.mxu1 }
 0x11a   : > { %627 = vst [vmem:[%s1215_s20 + $0xe0] sm:$0xff] %v492_v33  ;;  %659 = vst [vmem:[%s1215_s20 + $0x1e0] sm:$0xff] %v588_v34 }
 0x11b   : > { %v494_v35 = vpop.f32.mrf.mxu0  ;;  %v590_v36 = vpop.f32.mrf.mxu1 }
 0x11c   : > { %628 = vst [vmem:[%s1215_s20 + $0xe8] sm:$0xff] %v494_v35  ;;  %660 = vst [vmem:[%s1215_s20 + $0x1e8] sm:$0xff] %v590_v36 }
 0x11d   : > { %v498_v37 = vpop.f32.mrf.mxu0  ;;  %v594_v38 = vpop.f32.mrf.mxu1 }
 0x11e   : > { %629 = vst [vmem:[%s1215_s20 + $0xf0] sm:$0xff] %v498_v37  ;;  %661 = vst [vmem:[%s1215_s20 + $0x1f0] sm:$0xff] %v594_v38 }
 0x11f   : > { %v500_v39 = vpop.f32.mrf.mxu0  ;;  %v596_v40 = vpop.f32.mrf.mxu1 }
 0x120   : > { %630 = vst [vmem:[%s1215_s20 + $0xf8] sm:$0xff] %v500_v39  ;;  %662 = vst [vmem:[%s1215_s20 + $0x1f8] sm:$0xff] %v596_v40 }
 0x121   : > { %908 = shalt.err (!%p905_p5)
}
 0x122   : > { %s909_s4 = scalar_lea.hbm %s1282_s27, 8192  ;;  %s913_s7 = scalar_lea.hbm %s1339_s2, 16384 }
 0x123   : > { %p910_p6 = scmp.ne.s32.totalorder %s1282_s27, %s909_s4  ;;  %p914_p10 = scmp.lt.s32.totalorder %s1282_s27, %s1339_s2 }
 0x124   : > { %p915_p11 = scmp.lt.s32.totalorder %s913_s7, %s909_s4 }
 0x125   : > { %p911_p7 = pnand %p910_p6, %p1032_p4 }
 0x126   : > { %p916_p12 = por %p915_p11, %p914_p10 }
 0x127   : > { %p912_p9 = pneg %p911_p7 }
 0x129   : > { %p917_p13 = pnand %p916_p12, %p912_p9 }
 0x12b   : > { %920 = shalt.err (!%p917_p13)
}
 0x12c   : > { %s975_s16 = smov 256   ;;  %s976_s18 = smov 16  }
 0x12d   : > { %837 = dma.vmem_to_hbm [thread:$0]  (%p1032_p4), %s1284_s24, 8192, %s1282_s27, %s1292_s12, %s975_s16, %s975_s16, %s976_s18  }
 0x12e PF: > { %p843_p0 = scmp.ge.s32.totalorder %s971_s14, 2  ;;  %s697_s20 = sand.u32 1, %s951_s9  }
 0x12f   : > { %s698_s23 = scalar_lea.sflag [#allocation3], %s697_s20 }
 0x130   : > { %p840_p1 = pnand %p843_p0, %p1039_p8 }
 0x132   : > { %p841_p2 = pneg %p840_p1 }
 0x134   : > { %946 = dma.done.wait (%p841_p2), %s698_s23, 8192  }
 0x135   : > { %948 = vsyncadd (%p841_p2), %s698_s23, 4294959104  ;;  %s15_s14 = sadd.s32 1, %s971_s14   ;;  %s1342_s9 = smov %s955_s10 }
 0x136   : > { %p12_p3 = scmp.ge.s32.totalorder %s15_s14, 4   ;;  %s1343_s10 = smov %s959_s11 }
 0x137   : > { %s1344_s11 = smov %s1045_s22  ;;  %s1345_s12 = smov %s967_s13 }
 0x138   : > { %s1346_s13 = smov %s1348_s17  ;;  %14 = sbr.rel (!%p12_p3) target bundleno = 4 (0x4), region = 66 }
 0x13d   :  { %703 = vsyncpa [#allocation3], 1 }
 0x13e   :  { %705 = vsyncpa [#allocation3 + $0x1], 1 }

</bundles_post_ra>
